<compile_context>
chip_gen: v7x
topology: tpu7x:2x2x1
jax: 0.10.0
libtpu: 0.0.40
codegen_flags: <defaults>
</compile_context>

<pallas_src>
import functools

import numpy as np
import jax
import jax.numpy as jnp
from jax.experimental import pallas as pl
from jax.experimental.pallas import tpu as pltpu


def _round_up(a, m):
    return (a + m - 1) // m * m


def _marc_kernel(x_ref, wconv_ref, bconv_ref, wfc_ref, bfc_ref, out_ref,
                 *, TB, L, L_pad, Cin, K):
    """One batch block (TB rows) per grid step.

    x_ref     : (TB, L_pad + K - 1, Cin)  zero-padded input sequences (compute dtype)
    wconv_ref : (K*Cin, H_pad)            conv taps, tap-major (compute dtype)
    bconv_ref : (1, H_pad)                conv bias (f32)
    wfc_ref   : (H_pad, NC_pad)           fc weight^T with omega folded in, lane-padded
    bfc_ref   : (1, NC_pad)               omega*b_fc + beta*||W_fc|| (f32)
    out_ref   : (TB, NC_pad)              calibrated logits (f32)
    """
    cdt = x_ref.dtype
    H_pad = wconv_ref.shape[1]

    x = x_ref[...]                                       # (TB, L_ext, Cin)
    wconv = wconv_ref[...]                               # (K*Cin, H_pad)

    # Conv1d('same') as K shifted-slice matmuls accumulated in f32 on the MXU.
    acc = jnp.zeros((TB * L_pad, H_pad), jnp.float32)
    for k in range(K):                                   # K is small & static (unrolled)
        xk = x[:, k:k + L_pad, :].reshape(TB * L_pad, Cin)
        wk = wconv[k * Cin:(k + 1) * Cin, :]
        acc = acc + jnp.dot(xk, wk, preferred_element_type=jnp.float32)
    h = jnp.maximum(acc + bconv_ref[...], 0.0)           # (TB*L_pad, H_pad) f32

    # Global mean pool over the sequence: layout-free reshape (L_pad is a multiple
    # of the sublane tile) + cross-sublane sum on the XLU. Stays in f32.
    h3 = h.reshape(TB, L_pad, H_pad)
    if L_pad == L:
        pooled = jnp.sum(h3, axis=1) * (1.0 / L)                       # (TB, H_pad)
    else:
        # Mask the padded sequence positions (their h rows are ReLU(bias) != 0).
        l_idx = jax.lax.broadcasted_iota(jnp.int32, (1, L_pad, H_pad), 1)
        scale = jnp.where(l_idx < L, jnp.float32(1.0 / L), jnp.float32(0.0))
        pooled = jnp.sum(h3 * scale, axis=1)

    # fc with Marc calibration pre-folded into weight/bias.
    out_ref[...] = (jnp.dot(pooled.astype(cdt), wfc_ref[...],
                            preferred_element_type=jnp.float32)
                    + bfc_ref[...])                                    # (TB, NC_pad)


def marc_forward(x_ncl, params, *, kernel_size=3, compute_dtype=jnp.bfloat16):
    """x_ncl: (B, Cin, L) float32 (PyTorch NCL layout). Returns (B, NC) f32 logits."""
    B, Cin, L = x_ncl.shape
    H = params["w_conv"].shape[0]          # conv out channels
    NC = params["w_fc"].shape[0]           # num_classes
    K = kernel_size
    assert K % 2 == 1, "only odd kernel_size ('same' padding) is supported"
    pad = (K - 1) // 2

    itemsize = np.dtype(compute_dtype).itemsize
    sub = 32 // itemsize                   # sublane tile: 8 (f32) / 16 (bf16)
    L_pad = _round_up(L, sub)              # layout-free reshape in kernel needs this
    L_ext = L_pad + K - 1
    H_pad = _round_up(H, 128)              # lane-dense h / fc contraction
    NC_pad = _round_up(NC, 128)            # lane-dense output stores
    KCin = K * Cin

    # ---- batch block size from a VMEM budget (keeps v7x's 64 MiB happy) ----
    cin_lanes = _round_up(Cin, 128)        # VMEM lane-rounds the minor dim
    per_row = (2 * _round_up(L_ext, sub) * cin_lanes * itemsize   # x block (2-buffered)
               + 2 * L_pad * H_pad * 4                            # f32 conv intermediate
               + 2 * NC_pad * 4)                                  # out block (2-buffered)
    weight_bytes = (2 * (_round_up(KCin, sub) * H_pad + H_pad * NC_pad) * itemsize
                    + 2 * (H_pad + NC_pad) * 4)
    budget = 44 * 1024 * 1024 - weight_bytes
    tb_fit = max(8, (budget // per_row) // 8 * 8)
    TB = int(min(512, tb_fit, _round_up(B, 8)))
    # Guarantee >= 2 grid steps so the "parallel" axis can shard over v7x's two TCs.
    if B > 8 and _round_up(B, TB) // TB < 2:
        TB = int(min(max(8, _round_up(pl.cdiv(B, 2), 8)), tb_fit))
    B_pad = _round_up(B, TB)
    grid_b = B_pad // TB

    # ---- plain-JAX glue: layout + calibration folding (done once) ----
    x_blc = jnp.transpose(x_ncl, (0, 2, 1))                        # (B, L, Cin)
    x_slab = jnp.pad(
        x_blc, ((0, B_pad - B), (pad, pad + (L_pad - L)), (0, 0))
    ).astype(compute_dtype)                                        # (B_pad, L_ext, Cin)

    w_conv = jnp.transpose(params["w_conv"], (2, 1, 0)).reshape(KCin, H)   # (K*Cin, H)
    w_conv = jnp.pad(w_conv, ((0, 0), (0, H_pad - H))).astype(compute_dtype)
    b_conv = jnp.pad(params["b_conv"].reshape(1, H),
                     ((0, 0), (0, H_pad - H))).astype(jnp.float32)

    # Fold Marc calibration into the fc layer:
    #   omega*(p @ W^T + b) + beta*||W||  ==  p @ (W^T*omega) + (omega*b + beta*||W||)
    omega = params["omega"].reshape(NC)
    beta = params["beta"].reshape(NC)
    w_norm = jnp.linalg.norm(params["w_fc"], axis=1)               # (NC,)
    w_fc = params["w_fc"].T * omega[None, :]                       # (H, NC)
    w_fc = jnp.pad(w_fc, ((0, H_pad - H), (0, NC_pad - NC))).astype(compute_dtype)
    b_fc = omega * params["b_fc"].reshape(NC) + beta * w_norm
    b_fc = jnp.pad(b_fc, (0, NC_pad - NC)).reshape(1, NC_pad).astype(jnp.float32)

    kernel = functools.partial(_marc_kernel, TB=TB, L=L, L_pad=L_pad, Cin=Cin, K=K)

    out = pl.pallas_call(
        kernel,
        out_shape=jax.ShapeDtypeStruct((B_pad, NC_pad), jnp.float32),
        grid_spec=pltpu.PrefetchScalarGridSpec(
            num_scalar_prefetch=0,
            grid=(grid_b,),
            in_specs=[
                pl.BlockSpec((TB, L_ext, Cin), lambda b: (b, 0, 0)),  # x slab block
                pl.BlockSpec((KCin, H_pad), lambda b: (0, 0)),        # conv taps (flat)
                pl.BlockSpec((1, H_pad), lambda b: (0, 0)),           # conv bias
                pl.BlockSpec((H_pad, NC_pad), lambda b: (0, 0)),      # folded fc weight
                pl.BlockSpec((1, NC_pad), lambda b: (0, 0)),          # folded fc bias
            ],
            out_specs=pl.BlockSpec((TB, NC_pad), lambda b: (b, 0)),
        ),
        compiler_params=pltpu.CompilerParams(
            dimension_semantics=("parallel",),
            vmem_limit_bytes=56 * 1024 * 1024,
        ),
    )(x_slab, w_conv, b_conv, w_fc, b_fc)

    return out[:B, :NC]


def marc_reference(x_ncl, params, *, kernel_size=3):
    """Pure-JAX reference of the same math (for correctness check)."""
    pad = (kernel_size - 1) // 2
    h = jax.lax.conv_general_dilated(
        x_ncl, params["w_conv"], window_strides=(1,),
        padding=[(pad, pad)],
        dimension_numbers=("NCH", "OIH", "NCH"))
    h = jax.nn.relu(h + params["b_conv"][None, :, None])
    pooled = jnp.mean(h, axis=-1)                                  # (B, H)
    logit = pooled @ params["w_fc"].T + params["b_fc"]             # (B, NC)
    w_norm = jnp.linalg.norm(params["w_fc"], axis=1)
    return (params["omega"].reshape(1, -1) * logit
            + params["beta"].reshape(1, -1) * w_norm[None, :])


if __name__ == "__main__":
    B, Cin, L = 2, 4, 16          # batch, input channels, sequence length
    H, NC, K = 32, 8, 3           # hidden (conv out), num_classes, conv kernel

    key = jax.random.PRNGKey(0)
    k0, k1, k2, k3, k4 = jax.random.split(key, 5)

    params = {
        "w_conv": jax.random.normal(k0, (H, Cin, K), jnp.float32) * 0.1,
        "b_conv": jax.random.normal(k1, (H,), jnp.float32) * 0.01,
        "w_fc":   jax.random.normal(k2, (NC, H), jnp.float32) * 0.1,
        "b_fc":   jax.random.normal(k3, (NC,), jnp.float32) * 0.01,
        # Marc params: omega init = ones, beta init = zeros (as in nn.Module);
        # perturbed so the calibration terms are exercised.
        "omega":  jnp.ones((NC,), jnp.float32) + 0.05,
        "beta":   jnp.zeros((NC,), jnp.float32) + 0.02,
    }

    x = jax.random.normal(k4, (B, Cin, L), jnp.float32)
    ref = marc_reference(x, params, kernel_size=K)

    # f32 path: tight check.
    out_f32 = jax.block_until_ready(
        marc_forward(x, params, kernel_size=K, compute_dtype=jnp.float32))
    assert out_f32.shape == (B, NC)
    assert jnp.allclose(out_f32, ref, atol=1e-4, rtol=1e-4), (out_f32, ref)

    # bf16 MXU-operand path (default; v5e/v6e/v7x MXUs are bf16-native):
    # f32 accumulation, looser tolerance.
    out_bf16 = jax.block_until_ready(
        marc_forward(x, params, kernel_size=K, compute_dtype=jnp.bfloat16))
    assert out_bf16.shape == (B, NC)
    assert jnp.allclose(out_bf16, ref, atol=5e-2, rtol=5e-2), (out_bf16, ref)

    print("KERNEL_OK")
</pallas_src>

<mosaic_0001>
module attributes {stable_mosaic.version = 11 : i64} {
  func.func @_marc_kernel(%arg0: i32, %arg1: memref<8x18x4xf32, #tpu.memory_space<vmem>>, %arg2: memref<12x128xf32, #tpu.memory_space<vmem>>, %arg3: memref<1x128xf32, #tpu.memory_space<vmem>>, %arg4: memref<128x128xf32, #tpu.memory_space<vmem>>, %arg5: memref<1x128xf32, #tpu.memory_space<vmem>>, %arg6: memref<8x128xf32, #tpu.memory_space<vmem>>) attributes {dimension_semantics = [#tpu.dimension_semantics<parallel>], iteration_bounds = array<i64: 1>, scalar_prefetch = 0 : i64, scratch_operands = 0 : i64, tpu.core_type = #tpu.core_type<tc>, window_params = [{transform_indices = @transform_0, window_bounds = array<i64: 8, 18, 4>}, {pipeline_mode = #tpu.pipeline_mode<synchronous>, transform_indices = @transform_1, window_bounds = array<i64: 12, 128>}, {pipeline_mode = #tpu.pipeline_mode<synchronous>, transform_indices = @transform_2, window_bounds = array<i64: 1, 128>}, {pipeline_mode = #tpu.pipeline_mode<synchronous>, transform_indices = @transform_3, window_bounds = array<i64: 128, 128>}, {pipeline_mode = #tpu.pipeline_mode<synchronous>, transform_indices = @transform_4, window_bounds = array<i64: 1, 128>}, {transform_indices = @transform_5, window_bounds = array<i64: 8, 128>}]} {
    %c0 = arith.constant 0 : index
    %c0_0 = arith.constant 0 : index
    %c0_1 = arith.constant 0 : index
    %0 = vector.load %arg1[%c0, %c0_0, %c0_1] : memref<8x18x4xf32, #tpu.memory_space<vmem>>, vector<8x18x4xf32>
    %c0_2 = arith.constant 0 : index
    %c0_3 = arith.constant 0 : index
    %1 = vector.load %arg2[%c0_2, %c0_3] : memref<12x128xf32, #tpu.memory_space<vmem>>, vector<12x128xf32>
    %cst = arith.constant 0.000000e+00 : f32
    %2 = vector.broadcast %cst : f32 to vector<128x128xf32>
    %3 = vector.extract_strided_slice %0 {offsets = [0, 0, 0], sizes = [8, 16, 4], strides = [1, 1, 1]} : vector<8x18x4xf32> to vector<8x16x4xf32>
    %4 = vector.shape_cast %3 : vector<8x16x4xf32> to vector<128x4xf32>
    %5 = vector.extract_strided_slice %1 {offsets = [0, 0], sizes = [4, 128], strides = [1, 1]} : vector<12x128xf32> to vector<4x128xf32>
    %cst_4 = arith.constant dense<0.000000e+00> : vector<128x128xf32>
    %6 = tpu.matmul %4, %5, %cst_4 {dimension_numbers = #tpu.dot_dimension_numbers<[1], [0], [0], [1], [0, 0, 1, 1], [], []>} : vector<128x4xf32>, vector<4x128xf32>, vector<128x128xf32> -> vector<128x128xf32>
    %7 = arith.addf %2, %6 : vector<128x128xf32>
    %8 = vector.extract_strided_slice %0 {offsets = [0, 1, 0], sizes = [8, 16, 4], strides = [1, 1, 1]} : vector<8x18x4xf32> to vector<8x16x4xf32>
    %9 = vector.shape_cast %8 : vector<8x16x4xf32> to vector<128x4xf32>
    %10 = vector.extract_strided_slice %1 {offsets = [4, 0], sizes = [4, 128], strides = [1, 1]} : vector<12x128xf32> to vector<4x128xf32>
    %cst_5 = arith.constant dense<0.000000e+00> : vector<128x128xf32>
    %11 = tpu.matmul %9, %10, %cst_5 {dimension_numbers = #tpu.dot_dimension_numbers<[1], [0], [0], [1], [0, 0, 1, 1], [], []>} : vector<128x4xf32>, vector<4x128xf32>, vector<128x128xf32> -> vector<128x128xf32>
    %12 = arith.addf %7, %11 : vector<128x128xf32>
    %13 = vector.extract_strided_slice %0 {offsets = [0, 2, 0], sizes = [8, 16, 4], strides = [1, 1, 1]} : vector<8x18x4xf32> to vector<8x16x4xf32>
    %14 = vector.shape_cast %13 : vector<8x16x4xf32> to vector<128x4xf32>
    %15 = vector.extract_strided_slice %1 {offsets = [8, 0], sizes = [4, 128], strides = [1, 1]} : vector<12x128xf32> to vector<4x128xf32>
    %cst_6 = arith.constant dense<0.000000e+00> : vector<128x128xf32>
    %16 = tpu.matmul %14, %15, %cst_6 {dimension_numbers = #tpu.dot_dimension_numbers<[1], [0], [0], [1], [0, 0, 1, 1], [], []>} : vector<128x4xf32>, vector<4x128xf32>, vector<128x128xf32> -> vector<128x128xf32>
    %17 = arith.addf %12, %16 : vector<128x128xf32>
    %c0_7 = arith.constant 0 : index
    %c0_8 = arith.constant 0 : index
    %18 = vector.load %arg3[%c0_7, %c0_8] : memref<1x128xf32, #tpu.memory_space<vmem>>, vector<1x128xf32>
    %19 = vector.broadcast %18 : vector<1x128xf32> to vector<128x128xf32>
    %20 = arith.addf %17, %19 : vector<128x128xf32>
    %cst_9 = arith.constant 0.000000e+00 : f32
    %21 = vector.broadcast %cst_9 : f32 to vector<128x128xf32>
    %22 = arith.maximumf %20, %21 : vector<128x128xf32>
    %23 = vector.shape_cast %22 : vector<128x128xf32> to vector<8x16x128xf32>
    %cst_10 = arith.constant dense<0.000000e+00> : vector<8x128xf32>
    %24 = vector.multi_reduction <add>, %23, %cst_10 [1] : vector<8x16x128xf32> to vector<8x128xf32>
    %cst_11 = arith.constant 6.250000e-02 : f32
    %25 = vector.broadcast %cst_11 : f32 to vector<8x128xf32>
    %26 = arith.mulf %24, %25 : vector<8x128xf32>
    %c0_12 = arith.constant 0 : index
    %c0_13 = arith.constant 0 : index
    %27 = vector.load %arg4[%c0_12, %c0_13] : memref<128x128xf32, #tpu.memory_space<vmem>>, vector<128x128xf32>
    %cst_14 = arith.constant dense<0.000000e+00> : vector<8x128xf32>
    %28 = tpu.matmul %26, %27, %cst_14 {dimension_numbers = #tpu.dot_dimension_numbers<[1], [0], [0], [1], [0, 0, 1, 1], [], []>} : vector<8x128xf32>, vector<128x128xf32>, vector<8x128xf32> -> vector<8x128xf32>
    %c0_15 = arith.constant 0 : index
    %c0_16 = arith.constant 0 : index
    %29 = vector.load %arg5[%c0_15, %c0_16] : memref<1x128xf32, #tpu.memory_space<vmem>>, vector<1x128xf32>
    %30 = vector.broadcast %29 : vector<1x128xf32> to vector<8x128xf32>
    %31 = arith.addf %28, %30 : vector<8x128xf32>
    %c0_17 = arith.constant 0 : index
    %c0_18 = arith.constant 0 : index
    %32 = vector.load %arg6[%c0_17, %c0_18] : memref<8x128xf32, #tpu.memory_space<vmem>>, vector<8x128xf32>
    tpu.vector_store %arg6[%c0_17, %c0_18], %31 {strides = array<i32>} : memref<8x128xf32, #tpu.memory_space<vmem>>, vector<8x128xf32>,
    return
  }
  func.func @transform_0(%arg0: i32) -> (i32, i32, i32) {
    %c0_i32 = arith.constant 0 : i32
    %c0_i32_0 = arith.constant 0 : i32
    %c0_i32_1 = arith.constant 0 : i32
    return %arg0, %c0_i32, %c0_i32_0 : i32, i32, i32
  }
  func.func @transform_1(%arg0: i32) -> (i32, i32) {
    %c0_i32 = arith.constant 0 : i32
    %c0_i32_0 = arith.constant 0 : i32
    %c0_i32_1 = arith.constant 0 : i32
    return %c0_i32, %c0_i32_0 : i32, i32
  }
  func.func @transform_2(%arg0: i32) -> (i32, i32) {
    %c0_i32 = arith.constant 0 : i32
    %c0_i32_0 = arith.constant 0 : i32
    %c0_i32_1 = arith.constant 0 : i32
    return %c0_i32, %c0_i32_0 : i32, i32
  }
  func.func @transform_3(%arg0: i32) -> (i32, i32) {
    %c0_i32 = arith.constant 0 : i32
    %c0_i32_0 = arith.constant 0 : i32
    %c0_i32_1 = arith.constant 0 : i32
    return %c0_i32, %c0_i32_0 : i32, i32
  }
  func.func @transform_4(%arg0: i32) -> (i32, i32) {
    %c0_i32 = arith.constant 0 : i32
    %c0_i32_0 = arith.constant 0 : i32
    %c0_i32_1 = arith.constant 0 : i32
    return %c0_i32, %c0_i32_0 : i32, i32
  }
  func.func @transform_5(%arg0: i32) -> (i32, i32) {
    %c0_i32 = arith.constant 0 : i32
    %c0_i32_0 = arith.constant 0 : i32
    return %arg0, %c0_i32 : i32, i32
  }
}

</mosaic_0001>

<bundles_post_ra>
// kernel: tpu_custom_call.1
= control target key start
LH: loop header
LB: loop body
LE: loop exit
PB: predicated region body
PF: predicated region fallthrough
CT: control target
= control target key end

     0   :  { %vm147_vm0 = vcmask 1043456   ;;  %vm114_vm1 = vcmask 31744   ;;  %vm71_vm2 = vcmask 1046528   ;;  %s1673_s0 = inlined_call_operand.vmem [shape: f32[8,18,4], index: 0, kind: input, shape index: {}]   ;;  %s1674_s1 = inlined_call_operand.vmem [shape: f32[12,128], index: 1, kind: input, shape index: {}]   ;;  %s1675_s2 = inlined_call_operand.vmem [shape: f32[1,128], index: 2, kind: input, shape index: {}]   ;;  %s1676_s3 = inlined_call_operand.vmem [shape: f32[128,128], index: 3, kind: input, shape index: {}]   ;;  %s1677_s4 = inlined_call_operand.vmem [shape: f32[1,128], index: 4, kind: input, shape index: {}]   ;;  %s1678_s5 = inlined_call_operand.hbm [shape: f32[8,128], index: 5, kind: output, shape index: {}]  }
   0x1   :  { %v45_v0 = vld [vmem:[%s1674_s1] sm:$0xff]  ;;  %v1308_v2 = vld [vmem:[%s1673_s0 + $0x8] sm:$0xff]  ;;  %v1319_v4 = vld [vmem:[%s1673_s0 + $0x18] sm:$0xff] }
   0x2   :  { %v1303_v1 = vld [vmem:[%s1673_s0] sm:$0xff]  ;;  %1092 = vmatprep.subr.msk.mxu0 %vm147_vm0, %v45_v0  ;;  %v46_v3 = vld [vmem:[%s1674_s1 + $0x8] sm:$0xf]  ;;  %v113_v5 = vrot.slane %v45_v0, 4  ;;  %v1336_v7 = vld [vmem:[%s1673_s0 + $0x30] sm:$0xff]  ;;  %v77_v9 = vrot.slane %v1319_v4, 1 }
   0x3   :  { %1094 = vmatprep.mubr.msk.f32.mxu0 %vm114_vm1, %v1303_v1  ;;  %1093 = vmatpush3.msk.msra.mxu0 %vm147_vm0, %v45_v0  ;;  %v1331_v6 = vld [vmem:[%s1673_s0 + $0x20] sm:$0xff]  ;;  %v72_v8 = vrot.slane %v1303_v1, 1  ;;  %v1350_v11 = vld [vmem:[%s1673_s0 + $0x38] sm:$0xff]  ;;  %v1355_v12 = vld [vmem:[%s1673_s0 + $0x10] sm:$0x3]  ;;  %v73_v14 = vrot.slane %v1308_v2, 1 }
   0x4   :  { %1095 = vmatmul.mubr.msk.f32.vlgmr.msra.gmra.mrb[0].mxu0 %vm114_vm1, %v1308_v2  ;;  %1118 = vmatprep.subr.msk.mxu0 %vm147_vm0, %v46_v3  ;;  %v78_v10 = vrot.slane %v1331_v6, 1  ;;  %v1360_v13 = vld [vmem:[%s1673_s0 + $0x48] sm:$0xff]  ;;  %v82_v16 = vrot.slane %v1336_v7, 1  ;;  %v75_v17 = vrot.slane %v1355_v12, 1  ;;  %v83_v18 = vrot.slane %v1350_v11, 1  ;;  %v1386_v23 = vld [vmem:[%s1673_s0 + $0x50] sm:$0xff] }
   0x5   :  { %1119 = vmatpush3.msk.msra.mxu0 %vm147_vm0, %v46_v3  ;;  %1097 = vmatprep.mubr.msk.f32.mxu0 %vm114_vm1, %v1319_v4  ;;  %v1366_v15 = vld [vmem:[%s1673_s0 + $0x28] sm:$0x3]  ;;  %v74_v19 = vsel %vm71_vm2, %v72_v8, %v73_v14  ;;  %v1379_v22 = vld [vmem:[%s1673_s0 + $0x40] sm:$0x3] }
   0x6   :  { %1066 = vmatprep.subr.msk.mxu1 %vm147_vm0, %v113_v5  ;;  %v79_v20 = vsel %vm71_vm2, %v77_v9, %v78_v10  ;;  %v80_v21 = vrot.slane %v1366_v15, 1  ;;  %1068 = vmatprep.mubr.msk.f32.mxu1 %vm114_vm1, %v74_v19  ;;  %v76_v24 = vsel %vm71_vm2, %v73_v14, %v75_v17  ;;  %v1393_v25 = vld [vmem:[%s1673_s0 + $0x60] sm:$0xff] }
   0x7   :  { %1067 = vmatpush3.msk.msra.mxu1 %vm147_vm0, %v113_v5 }
   0x8   :  { %1098 = vmatmul.mubr.msk.f32.gmra.mrb[2].mxu0 %vm114_vm1, %v1331_v6  ;;  %1069 = vmatmul.mubr.msk.f32.vlgmr.msra.gmra.mrb[0].mxu1 %vm114_vm1, %v76_v24 }
   0x9   :  { %1100 = vmatprep.mubr.msk.f32.mxu0 %vm114_vm1, %v1336_v7 }
   0xc   :  { %1101 = vmatmul.mubr.msk.f32.gmra.mrb[4].mxu0 %vm114_vm1, %v1350_v11 }
   0xd   :  { %1103 = vmatprep.mubr.msk.f32.mxu0 %vm114_vm1, %v1360_v13 }
   0xe   :  { %10 = vsyncpa [#allocation3], 0  ;;  %1071 = vmatprep.mubr.msk.f32.mxu1 %vm114_vm1, %v79_v20  ;;  %v81_v26 = vsel %vm71_vm2, %v78_v10, %v80_v21  ;;  %v85_v27 = vrot.slane %v1379_v22, 1  ;;  %v87_v28 = vrot.slane %v1360_v13, 1  ;;  %v88_v29 = vrot.slane %v1386_v23, 1  ;;  %v1414_v32 = vld [vmem:[%s1673_s0 + $0x68] sm:$0xff] }
   0xf   :  { %v84_v30 = vsel %vm71_vm2, %v82_v16, %v83_v18  ;;  %v1407_v31 = vld [vmem:[%s1673_s0 + $0x58] sm:$0x3]  ;;  %1072 = vmatmul.mubr.msk.f32.gmra.mrb[2].mxu1 %vm114_vm1, %v81_v26  ;;  %v92_v36 = vrot.slane %v1393_v25, 1  ;;  %v93_v37 = vrot.slane %v1414_v32, 1  ;;  %v1433_v39 = vld [vmem:[%s1673_s0 + $0x70] sm:$0x3] }
  0x10   :  { %1104 = vmatmul.mubr.msk.f32.gmra.mrb[6].mxu0 %vm114_vm1, %v1386_v23  ;;  %v1419_v33 = vld [vmem:[%s1673_s0 + $0x78] sm:$0xff]  ;;  %1074 = vmatprep.mubr.msk.f32.mxu1 %vm114_vm1, %v84_v30  ;;  %v86_v34 = vsel %vm71_vm2, %v83_v18, %v85_v27  ;;  %v90_v35 = vrot.slane %v1407_v31, 1  ;;  %v89_v38 = vsel %vm71_vm2, %v87_v28, %v88_v29  ;;  %v1440_v40 = vld [vmem:[%s1673_s0 + $0x80] sm:$0xff]  ;;  %v1445_v41 = vld [vmem:[%s1673_s0 + $0x90] sm:$0xff]  ;;  %v95_v43 = vrot.slane %v1433_v39, 1  ;;  %s1266_s24 = smov [#allocation2]  }
  0x11   :  { %1106 = vmatprep.mubr.msk.f32.mxu0 %vm114_vm1, %v1393_v25  ;;  %v97_v44 = vrot.slane %v1419_v33, 1  ;;  %v98_v45 = vrot.slane %v1440_v40, 1  ;;  %v94_v46 = vsel %vm71_vm2, %v92_v36, %v93_v37  ;;  %v1459_v47 = vld [vmem:[%s1673_s0 + $0x88] sm:$0x3]  ;;  %v1466_v48 = vld [vmem:[%s1673_s0 + $0x98] sm:$0xff]  ;;  %v475_v49 = vrot.slane %v1303_v1, 2 }
  0x12   :  { %v91_v42 = vsel %vm71_vm2, %v88_v29, %v90_v35  ;;  %v476_v50 = vrot.slane %v1308_v2, 2  ;;  %v1473_v51 = vld [vmem:[%s1673_s0 + $0xa8] sm:$0xff]  ;;  %vm474_vm3 = vcmask 1045504   ;;  %v96_v52 = vsel %vm71_vm2, %v93_v37, %v95_v43  ;;  %v1487_v57 = vld [vmem:[%s1673_s0 + $0xa0] sm:$0x3]  ;;  %v1494_v58 = vld [vmem:[%s1673_s0 + $0xb0] sm:$0xff] }
  0x13   :  { %1075 = vmatmul.mubr.msk.f32.gmra.mrb[4].mxu1 %vm114_vm1, %v86_v34  ;;  %v100_v53 = vrot.slane %v1459_v47, 1  ;;  %v102_v54 = vrot.slane %v1445_v41, 1  ;;  %v103_v55 = vrot.slane %v1466_v48, 1  ;;  %v99_v56 = vsel %vm71_vm2, %v97_v44, %v98_v45  ;;  %v814_v43 = vld [vmem:[%s1676_s3] sm:$0xff]  ;;  %v815_v44 = vld [vmem:[%s1676_s3 + $0x8] sm:$0xff]  ;;  %s937_s25 = sshll.u32 %s1266_s24, 4  ;;  %s938_s25 = int_to_ptr.vmem [resolvable:$true] %s937_s25 }
  0x14   :  { %1107 = vmatmul.mubr.msk.f32.gmra.mrb[8].mxu0 %vm114_vm1, %v1414_v32  ;;  %1077 = vmatprep.mubr.msk.f32.mxu1 %vm114_vm1, %v89_v38  ;;  %v478_v59 = vrot.slane %v1355_v12, 2  ;;  %v480_v60 = vrot.slane %v1319_v4, 2  ;;  %v481_v61 = vrot.slane %v1331_v6, 2  ;;  %v477_v62 = vsel %vm474_vm3, %v475_v49, %v476_v50  ;;  %v44_v4 = vld [vmem:[%s1673_s0 + $0xb8] sm:$0x3]  ;;  %s1239_s26 = scalar_lea.vmem %s938_s25, 128  ;;  %p1244_p1 = scmp.lt.s32.totalorder %s938_s25, %s938_s25 }
  0x15   :  { %1109 = vmatprep.mubr.msk.f32.mxu0 %vm114_vm1, %v1419_v33  ;;  %v101_v63 = vsel %vm71_vm2, %v98_v45, %v100_v53  ;;  %v105_v0 = vrot.slane %v1487_v57, 1  ;;  %v107_v1 = vrot.slane %v1473_v51, 1  ;;  %v108_v2 = vrot.slane %v1494_v58, 1  ;;  %v820_v53 = vld [vmem:[%s1676_s3 + $0x30] sm:$0xff]  ;;  %p1240_p0 = scmp.ne.s32.totalorder %s938_s25, %s1239_s26  ;;  %p1245_p2 = scmp.lt.s32.totalorder %s1239_s26, %s1239_s26 }
  0x16   :  { %v104_v3 = vsel %vm71_vm2, %v102_v54, %v103_v55  ;;  %v479_v5 = vsel %vm474_vm3, %v476_v50, %v478_v59  ;;  %v483_v6 = vrot.slane %v1366_v15, 2  ;;  %v485_v8 = vrot.slane %v1336_v7, 2  ;;  %v818_v50 = vld [vmem:[%s1676_s3 + $0x20] sm:$0xff]  ;;  %v821_v54 = vld [vmem:[%s1676_s3 + $0x38] sm:$0xff]  ;;  %v824_v59 = vld [vmem:[%s1676_s3 + $0x50] sm:$0xff] }
  0x17   :  { %1078 = vmatmul.mubr.msk.f32.gmra.mrb[6].mxu1 %vm114_vm1, %v91_v42  ;;  %v486_v9 = vrot.slane %v1350_v11, 2  ;;  %v482_v10 = vsel %vm474_vm3, %v480_v60, %v481_v61  ;;  %v106_v12 = vsel %vm71_vm2, %v103_v55, %v105_v0  ;;  %v110_v14 = vrot.slane %v44_v4, 1  ;;  %v825_v60 = vld [vmem:[%s1676_s3 + $0x58] sm:$0xff]  ;;  %p1246_p3 = por %p1245_p2, %p1244_p1 }
  0x18   :  { %1110 = vmatmul.mubr.msk.f32.gmra.mrb[10].mxu0 %vm114_vm1, %v1440_v40  ;;  %1080 = vmatprep.mubr.msk.f32.mxu1 %vm114_vm1, %v94_v46  ;;  %v109_v16 = vsel %vm71_vm2, %v107_v1, %v108_v2  ;;  %v484_v15 = vsel %vm474_vm3, %v481_v61, %v483_v6  ;;  %v488_v7 = vrot.slane %v1379_v22, 2  ;;  %v490_v11 = vrot.slane %v1360_v13, 2  ;;  %v828_v1 = vld [vmem:[%s1676_s3 + $0x70] sm:$0xff] }
  0x19   :  { %1112 = vmatprep.mubr.msk.f32.mxu0 %vm114_vm1, %v1445_v41  ;;  %v491_v17 = vrot.slane %v1386_v23, 2  ;;  %v487_v18 = vsel %vm474_vm3, %v485_v8, %v486_v9  ;;  %v111_v19 = vsel %vm71_vm2, %v108_v2, %v110_v14  ;;  %v493_v21 = vrot.slane %v1407_v31, 2  ;;  %v829_v2 = vld [vmem:[%s1676_s3 + $0x78] sm:$0xff]  ;;  %p1247_p4 = pnand %p1246_p3, %p1240_p0 }
  0x1a   :  { %v489_v20 = vsel %vm474_vm3, %v486_v9, %v488_v7  ;;  %v495_v13 = vrot.slane %v1393_v25, 2  ;;  %v496_v22 = vrot.slane %v1414_v32, 2  ;;  %v498_v26 = vrot.slane %v1433_v39, 2 }
  0x1b   :  { %1081 = vmatmul.mubr.msk.f32.gmra.mrb[8].mxu1 %vm114_vm1, %v96_v52  ;;  %v492_v23 = vsel %vm474_vm3, %v490_v11, %v491_v17  ;;  %v494_v24 = vsel %vm474_vm3, %v491_v17, %v493_v21  ;;  %v500_v27 = vrot.slane %v1419_v33, 2  ;;  %v501_v28 = vrot.slane %v1440_v40, 2 }
  0x1c   :  { %1113 = vmatmul.mubr.msk.f32.gmra.mrb[12].mxu0 %vm114_vm1, %v1466_v48  ;;  %1083 = vmatprep.mubr.msk.f32.mxu1 %vm114_vm1, %v99_v56  ;;  %v497_v25 = vsel %vm474_vm3, %v495_v13, %v496_v22  ;;  %v499_v29 = vsel %vm474_vm3, %v496_v22, %v498_v26  ;;  %v503_v30 = vrot.slane %v1459_v47, 2  ;;  %v505_v31 = vrot.slane %v1445_v41, 2  ;;  %v816_v47 = vld [vmem:[%s1676_s3 + $0x10] sm:$0xff]  ;;  %v822_v56 = vld [vmem:[%s1676_s3 + $0x40] sm:$0xff] }
  0x1d   :  { %1115 = vmatprep.mubr.msk.f32.mxu0 %vm114_vm1, %v1473_v51  ;;  %v506_v32 = vrot.slane %v1466_v48, 2  ;;  %v502_v34 = vsel %vm474_vm3, %v500_v27, %v501_v28  ;;  %v508_v35 = vrot.slane %v1487_v57, 2  ;;  %v510_v36 = vrot.slane %v1473_v51, 2  ;;  %v817_v48 = vld [vmem:[%s1676_s3 + $0x18] sm:$0xff]  ;;  %v819_v51 = vld [vmem:[%s1676_s3 + $0x28] sm:$0xff] }
  0x1e   :  { %v504_v33 = vsel %vm474_vm3, %v501_v28, %v503_v30  ;;  %v511_v37 = vrot.slane %v1494_v58, 2  ;;  %v513_v40 = vrot.slane %v44_v4, 2  ;;  %v1180_v45 = vpack.c.bf16 %v815_v44, %v814_v43  ;;  %v823_v57 = vld [vmem:[%s1676_s3 + $0x48] sm:$0xff] }
  0x1f   :  { %1084 = vmatmul.mubr.msk.f32.gmra.mrb[10].mxu1 %vm114_vm1, %v101_v63  ;;  %v507_v38 = vsel %vm474_vm3, %v505_v31, %v506_v32  ;;  %v509_v39 = vsel %vm474_vm3, %v506_v32, %v508_v35  ;;  %v1263_v46 = vmov 0.0|0.0   ;;  %v1183_v49 = vpack.c.bf16 %v817_v48, %v816_v47  ;;  %v827_v63 = vld [vmem:[%s1676_s3 + $0x68] sm:$0xff] }
  0x20   :  { %1116 = vmatmul.mubr.msk.f32.gmra.mrb[14].mxu0 %vm114_vm1, %v1494_v58  ;;  %1086 = vmatprep.mubr.msk.f32.mxu1 %vm114_vm1, %v104_v3  ;;  %v512_v41 = vsel %vm474_vm3, %v510_v36, %v511_v37  ;;  %v514_v42 = vsel %vm474_vm3, %v511_v37, %v513_v40  ;;  %v1186_v52 = vpack.c.bf16 %v819_v51, %v818_v50  ;;  %vm1264_vm4 = vmmov 0  }
  0x21   :  { %1120 = vmatprep.mubr.msk.f32.mxu0 %vm114_vm1, %v477_v62  ;;  %1179 = vmatprep.subr.bf16.mxu1 %v1263_v46  ;;  %v1189_v55 = vpack.c.bf16 %v821_v54, %v820_v53  ;;  %v1192_v58 = vpack.c.bf16 %v823_v57, %v822_v56  ;;  %v1195_v61 = vpack.c.bf16 %v825_v60, %v824_v59  ;;  %v826_v62 = vld [vmem:[%s1676_s3 + $0x60] sm:$0xff]  ;;  %v1265_v4 = vmov 0.0  }
  0x22   :  { %1181 = vmatpush3.bf16.msra.mxu1 %v1180_v45  ;;  %v1198_v0 = vpack.c.bf16 %v827_v63, %v826_v62  ;;  %v1201_v3 = vpack.c.bf16 %v829_v2, %v828_v1  ;;  %vm845_vm5 = vcmask 1041409   ;;  %vm847_vm6 = vcmask 1042434  }
  0x23   :  { %1087 = vmatmul.mubr.msk.f32.gmra.mrb[12].mxu1 %vm114_vm1, %v106_v12  ;;  %1182 = vmatprep.subr.bf16.mxu1 %v1263_v46  ;;  %vm849_vm7 = vcmask 1043459   ;;  %vm851_vm8 = vcmask 1044484   ;;  %vm853_vm9 = vcmask 1045509   ;;  %vm855_vm10 = vcmask 1046534  }
  0x24   :  { %1121 = vmatmul.mubr.msk.f32.vlgmr.msra.gmra.mrb[0].mxu0 %vm114_vm1, %v479_v5  ;;  %1089 = vmatprep.mubr.msk.f32.mxu1 %vm114_vm1, %v109_v16  ;;  %vm857_vm11 = vcmask 1047559  }
  0x25   :  { %1123 = vmatprep.mubr.msk.f32.mxu0 %vm114_vm1, %v482_v10 }
  0x26   :  { %1184 = vmatpush3.bf16.msra.mxu1 %v1183_v49 }
  0x27   :  { %1090 = vmatmul.mubr.msk.f32.gmra.mrb[14].mxu1 %vm114_vm1, %v111_v19  ;;  %1185 = vmatprep.subr.bf16.mxu1 %v1263_v46  ;;  %v1624_v19 = vld [vmem:[%s1675_s2] ss:$0 sm:$0xff] }
  0x28   :  { %1124 = vmatmul.mubr.msk.f32.gmra.mrb[2].mxu0 %vm114_vm1, %v484_v15  ;;  %1176 = vmatprep.mubr.msk.f32.mxu1 %vm1264_vm4, %v1265_v4 }
  0x29   :  { %1126 = vmatprep.mubr.msk.f32.mxu0 %vm114_vm1, %v487_v18 }
  0x2a   :  { %1187 = vmatpush3.bf16.msra.mxu1 %v1186_v52 }
  0x2b   :  { %1188 = vmatprep.subr.bf16.mxu1 %v1263_v46 }
  0x2c   :  { %1127 = vmatmul.mubr.msk.f32.gmra.mrb[4].mxu0 %vm114_vm1, %v489_v20 }
  0x2d   :  { %1129 = vmatprep.mubr.msk.f32.mxu0 %vm114_vm1, %v492_v23 }
  0x2e   :  { %1190 = vmatpush3.bf16.msra.mxu1 %v1189_v55 }
  0x2f   :  { %1191 = vmatprep.subr.bf16.mxu1 %v1263_v46 }
  0x30   :  { %1130 = vmatmul.mubr.msk.f32.gmra.mrb[6].mxu0 %vm114_vm1, %v494_v24 }
  0x31   :  { %1132 = vmatprep.mubr.msk.f32.mxu0 %vm114_vm1, %v497_v25 }
  0x32   :  { %1193 = vmatpush3.bf16.msra.mxu1 %v1192_v58 }
  0x33   :  { %1194 = vmatprep.subr.bf16.mxu1 %v1263_v46 }
  0x34   :  { %1133 = vmatmul.mubr.msk.f32.gmra.mrb[8].mxu0 %vm114_vm1, %v499_v29 }
  0x35   :  { %1135 = vmatprep.mubr.msk.f32.mxu0 %vm114_vm1, %v502_v34 }
  0x36   :  { %1196 = vmatpush3.bf16.msra.mxu1 %v1195_v61 }
  0x37   :  { %1197 = vmatprep.subr.bf16.mxu1 %v1263_v46 }
  0x38   :  { %1136 = vmatmul.mubr.msk.f32.gmra.mrb[10].mxu0 %vm114_vm1, %v504_v33 }
  0x39   :  { %1138 = vmatprep.mubr.msk.f32.mxu0 %vm114_vm1, %v507_v38 }
  0x3a   :  { %1199 = vmatpush3.bf16.msra.mxu1 %v1198_v0 }
  0x3b   :  { %1200 = vmatprep.subr.bf16.mxu1 %v1263_v46 }
  0x3c   :  { %1139 = vmatmul.mubr.msk.f32.gmra.mrb[12].mxu0 %vm114_vm1, %v509_v39 }
  0x3d   :  { %1141 = vmatprep.mubr.msk.f32.mxu0 %vm114_vm1, %v512_v41 }
  0x3e   :  { %1202 = vmatpush3.bf16.msra.mxu1 %v1201_v3 }
  0x40   :  { %1142 = vmatmul.mubr.msk.f32.gmra.mrb[14].mxu0 %vm114_vm1, %v514_v42 }
  0xdb   :  { %v1070_v5 = vpop.f32.mrb[0].mxu1 }
  0xdc   :  { %v216_v6 = vpop.f32.mrb[1].mxu1 }
  0xe2   :  { %v1073_v8 = vpop.f32.mrb[2].mxu1 }
  0xe3   :  { %v226_v9 = vpop.f32.mrb[3].mxu1 }
  0xe6   :  { %v1076_v10 = vpop.f32.mrb[4].mxu1 }
  0xe7   :  { %v236_v12 = vpop.f32.mrb[5].mxu1 }
  0xea   :  { %v1079_v14 = vpop.f32.mrb[6].mxu1 }
  0xeb   :  { %v246_v16 = vpop.f32.mrb[7].mxu1 }
  0xee   :  { %v1082_v15 = vpop.f32.mrb[8].mxu1 }
  0xef   :  { %v256_v7 = vpop.f32.mrb[9].mxu1 }
  0xf2   :  { %v1617_v11 = vpop.f32.mrb[10].mxu1 }
  0xf3   :  { %v1619_v17 = vpop.f32.mrb[11].mxu1 }
  0xf6   :  { %v1626_v22 = vpop.f32.mrb[12].mxu1 }
  0xf7   :  { %v1122_v18 = vpop.f32.mrb[0].mxu0  ;;  %v1629_v24 = vpop.f32.mrb[13].mxu1 }
  0xf8   :  { %v1203_v20 = vadd.f32 %v1122_v18, %v1070_v5  ;;  %v616_v21 = vpop.f32.mrb[1].mxu0 }
  0xf9   :  { %v1204_v13 = vadd.f32 %v616_v21, %v216_v6 }
  0xfa   :  { %v719_v23 = vadd.f32 %v1203_v20, %v1624_v19  ;;  %v1632_v32 = vpop.f32.mrb[14].mxu1 }
  0xfb   :  { %v718_v26 = vadd.f32 %v1204_v13, %v1624_v19  ;;  %v1125_v27 = vpop.f32.mrb[2].mxu0  ;;  %v1635_v33 = vpop.f32.mrb[15].mxu1 }
  0xfc   :  { %v735_v28 = vmax.f32 %v719_v23, 0.0  ;;  %v1205_v25 = vadd.f32 %v1125_v27, %v1073_v8  ;;  %v626_v29 = vpop.f32.mrb[3].mxu0 }
  0xfd   :  { %v734_v30 = vmax.f32 %v718_v26, 0.0  ;;  %v1206_v31 = vadd.f32 %v626_v29, %v226_v9 }
  0xfe   :  { %v721_v34 = vadd.f32 %v1205_v25, %v1624_v19 }
  0xff   :  { %v750_v35 = vadd.f32 %v735_v28, %v734_v30  ;;  %v720_v36 = vadd.f32 %v1206_v31, %v1624_v19  ;;  %v1128_v37 = vpop.f32.mrb[4].mxu0 }
 0x100   :  { %v737_v38 = vmax.f32 %v721_v34, 0.0  ;;  %v1207_v39 = vadd.f32 %v1128_v37, %v1076_v10  ;;  %v636_v40 = vpop.f32.mrb[5].mxu0 }
 0x101   :  { %v751_v41 = vrot.slane %v750_v35, 4  ;;  %v736_v42 = vmax.f32 %v720_v36, 0.0  ;;  %v1208_v43 = vadd.f32 %v636_v40, %v236_v12 }
 0x102   :  { %v723_v44 = vadd.f32 %v1207_v39, %v1624_v19 }
 0x103   :  { %v752_v45 = vadd.f32 %v751_v41, %v750_v35  ;;  %v757_v46 = vadd.f32 %v737_v38, %v736_v42  ;;  %v722_v47 = vadd.f32 %v1208_v43, %v1624_v19  ;;  %v1131_v48 = vpop.f32.mrb[6].mxu0 }
 0x104   :  { %v739_v49 = vmax.f32 %v723_v44, 0.0  ;;  %v1209_v50 = vadd.f32 %v1131_v48, %v1079_v14  ;;  %v646_v51 = vpop.f32.mrb[7].mxu0 }
 0x105   :  { %v753_v52 = vrot.slane %v752_v45, 2  ;;  %v758_v53 = vrot.slane %v757_v46, 4  ;;  %v738_v54 = vmax.f32 %v722_v47, 0.0  ;;  %v1210_v55 = vadd.f32 %v646_v51, %v246_v16 }
 0x106   :  { %v725_v56 = vadd.f32 %v1209_v50, %v1624_v19 }
 0x107   :  { %v754_v57 = vadd.f32 %v753_v52, %v752_v45  ;;  %v759_v58 = vadd.f32 %v758_v53, %v757_v46  ;;  %v764_v59 = vadd.f32 %v739_v49, %v738_v54  ;;  %v724_v60 = vadd.f32 %v1210_v55, %v1624_v19  ;;  %v1134_v61 = vpop.f32.mrb[8].mxu0 }
 0x108   :  { %v741_v62 = vmax.f32 %v725_v56, 0.0  ;;  %v1211_v63 = vadd.f32 %v1134_v61, %v1082_v15  ;;  %v656_v0 = vpop.f32.mrb[9].mxu0 }
 0x109   :  { %v755_v1 = vrot.slane %v754_v57, 1  ;;  %v760_v2 = vrot.slane %v759_v58, 2  ;;  %v765_v3 = vrot.slane %v764_v59, 4  ;;  %v740_v4 = vmax.f32 %v724_v60, 0.0 }
 0x10a   :  { %v727_v5 = vadd.f32 %v1211_v63, %v1624_v19  ;;  %v1212_v6 = vadd.f32 %v656_v0, %v256_v7 }
 0x10b   :  { %v756_v8 = vadd.f32 %v755_v1, %v754_v57  ;;  %v761_v9 = vadd.f32 %v760_v2, %v759_v58  ;;  %v766_v10 = vadd.f32 %v765_v3, %v764_v59  ;;  %v771_v12 = vadd.f32 %v741_v62, %v740_v4  ;;  %v1137_v14 = vpop.f32.mrb[10].mxu0 }
 0x10c   :  { %v743_v16 = vmax.f32 %v727_v5, 0.0  ;;  %v726_v18 = vadd.f32 %v1212_v6, %v1624_v19  ;;  %v1213_v20 = vadd.f32 %v1137_v14, %v1617_v11  ;;  %v666_v21 = vpop.f32.mrb[11].mxu0 }
 0x10d   :  { %v762_v15 = vrot.slane %v761_v9, 1  ;;  %v767_v13 = vrot.slane %v766_v10, 2  ;;  %v772_v23 = vrot.slane %v771_v12, 4  ;;  %v1214_v7 = vadd.f32 %v666_v21, %v1619_v17 }
 0x10e   :  { %v742_v26 = vmax.f32 %v726_v18, 0.0  ;;  %v729_v27 = vadd.f32 %v1213_v20, %v1624_v19  ;;  %v806_v28 = vmul.f32 0.0625, %v756_v8 }
 0x10f   :  { %v763_v25 = vadd.f32 %v762_v15, %v761_v9  ;;  %v768_v29 = vadd.f32 %v767_v13, %v766_v10  ;;  %v773_v30 = vadd.f32 %v772_v23, %v771_v12  ;;  %v1140_v31 = vpop.f32.mrb[12].mxu0  ;;  %v728_v36 = vadd.f32 %v1214_v7, %v1624_v19 }
 0x110   :  { %v778_v34 = vadd.f32 %v743_v16, %v742_v26  ;;  %v745_v35 = vmax.f32 %v729_v27, 0.0  ;;  %v1215_v11 = vadd.f32 %v1140_v31, %v1626_v22  ;;  %v676_v37 = vpop.f32.mrb[13].mxu0 }
 0x111   :  { %v807_v38 = vmul.f32 0.0625, %v763_v25  ;;  %v769_v39 = vrot.slane %v768_v29, 1  ;;  %v774_v40 = vrot.slane %v773_v30, 2  ;;  %v1216_v41 = vadd.f32 %v676_v37, %v1629_v24 }
 0x112   :  { %v779_v42 = vrot.slane %v778_v34, 4  ;;  %v744_v17 = vmax.f32 %v728_v36, 0.0  ;;  %v731_v43 = vadd.f32 %v1215_v11, %v1624_v19  ;;  %v997_v36 = vld [vmem:[%s1677_s4] ss:$0 sm:$0xff] }
 0x113   :  { %v846_v44 = vsel %vm845_vm5, %v807_v38, %v806_v28  ;;  %v770_v45 = vadd.f32 %v769_v39, %v768_v29  ;;  %v775_v46 = vadd.f32 %v774_v40, %v773_v30  ;;  %v730_v47 = vadd.f32 %v1216_v41, %v1624_v19  ;;  %v1143_v48 = vpop.f32.mrb[14].mxu0 }
 0x114   :  { %v780_v49 = vadd.f32 %v779_v42, %v778_v34  ;;  %v785_v22 = vadd.f32 %v745_v35, %v744_v17  ;;  %v747_v50 = vmax.f32 %v731_v43, 0.0  ;;  %v1217_v51 = vadd.f32 %v1143_v48, %v1632_v32  ;;  %v686_v52 = vpop.f32.mrb[15].mxu0 }
 0x115   :  { %v808_v53 = vmul.f32 0.0625, %v770_v45  ;;  %v776_v24 = vrot.slane %v775_v46, 1  ;;  %v746_v54 = vmax.f32 %v730_v47, 0.0  ;;  %v1218_v55 = vadd.f32 %v686_v52, %v1635_v33 }
 0x116   :  { %v781_v56 = vrot.slane %v780_v49, 2  ;;  %v786_v57 = vrot.slane %v785_v22, 4  ;;  %v733_v58 = vadd.f32 %v1217_v51, %v1624_v19 }
 0x117   :  { %v848_v59 = vsel %vm847_vm6, %v808_v53, %v846_v44  ;;  %v777_v60 = vadd.f32 %v776_v24, %v775_v46  ;;  %v792_v61 = vadd.f32 %v747_v50, %v746_v54  ;;  %v732_v62 = vadd.f32 %v1218_v55, %v1624_v19 }
 0x118   :  { %v782_v63 = vadd.f32 %v781_v56, %v780_v49  ;;  %v787_v0 = vadd.f32 %v786_v57, %v785_v22  ;;  %v749_v1 = vmax.f32 %v733_v58, 0.0 }
 0x119   :  { %v809_v32 = vmul.f32 0.0625, %v777_v60  ;;  %v793_v2 = vrot.slane %v792_v61, 4  ;;  %v748_v3 = vmax.f32 %v732_v62, 0.0 }
 0x11a   :  { %v783_v4 = vrot.slane %v782_v63, 1  ;;  %v788_v5 = vrot.slane %v787_v0, 2 }
 0x11b   :  { %v794_v33 = vadd.f32 %v793_v2, %v792_v61  ;;  %v799_v6 = vadd.f32 %v749_v1, %v748_v3  ;;  %v850_v8 = vsel %vm849_vm7, %v809_v32, %v848_v59 }
 0x11c   :  { %v784_v9 = vadd.f32 %v783_v4, %v782_v63  ;;  %v789_v10 = vadd.f32 %v788_v5, %v787_v0 }
 0x11d   :  { %v795_v12 = vrot.slane %v794_v33, 2  ;;  %v800_v14 = vrot.slane %v799_v6, 4 }
 0x11e   :  { %v810_v16 = vmul.f32 0.0625, %v784_v9  ;;  %v790_v18 = vrot.slane %v789_v10, 1 }
 0x11f   :  { %v796_v19 = vadd.f32 %v795_v12, %v794_v33  ;;  %v801_v20 = vadd.f32 %v800_v14, %v799_v6 }
 0x120   :  { %v791_v21 = vadd.f32 %v790_v18, %v789_v10  ;;  %v852_v15 = vsel %vm851_vm8, %v810_v16, %v850_v8 }
 0x121   :  { %v797_v13 = vrot.slane %v796_v19, 1  ;;  %v802_v23 = vrot.slane %v801_v20, 2 }
 0x122   :  { %v811_v26 = vmul.f32 0.0625, %v791_v21 }
 0x123   :  { %v798_v27 = vadd.f32 %v797_v13, %v796_v19  ;;  %v803_v7 = vadd.f32 %v802_v23, %v801_v20 }
 0x124   :  { %v854_v28 = vsel %vm853_vm9, %v811_v26, %v852_v15 }
 0x125   :  { %v812_v25 = vmul.f32 0.0625, %v798_v27  ;;  %v804_v29 = vrot.slane %v803_v7, 1 }
 0x127   :  { %v805_v30 = vadd.f32 %v804_v29, %v803_v7  ;;  %v856_v31 = vsel %vm855_vm10, %v812_v25, %v854_v28 }
 0x129   :  { %v813_v34 = vmul.f32 0.0625, %v805_v30 }
 0x12b   :  { %v858_v35 = vsel %vm857_vm11, %v813_v34, %v856_v31 }
 0x12c   :  { %1177 = vmatmul.mubr.f32.vlgmr.msra.gmra.mrb[16].mxu1 %v858_v35 }
 0x1ff   :  { %v926_v11 = vpop.f32.mrb[16].mxu1 }
 0x200   :  { %v927_v37 = vadd.f32 %v997_v36, %v926_v11  ;;  %v1178_v38 = vpop.f32.mrb[17].mxu1 }
 0x202   :  { %930 = vst [vmem:[#allocation2] sm:$0xff] %v927_v37 }
 0x203   :  { %1250 = shalt.err (!%p1247_p4)
}
 0x204   :  { %s1251_s1 = scalar_lea.hbm %s1678_s5, 128 }
 0x205   :  { %p1252_p5 = scmp.ne.s32.totalorder %s1678_s5, %s1251_s1  ;;  %p1255_p6 = scmp.lt.u32.totalorder %s1251_s1, %s1678_s5 }
 0x207   :  { %p1257_p7 = pnand %p1255_p6, %p1252_p5 }
 0x209   :  { %1260 = shalt.err (!%p1257_p7)
}
 0x20a   :  { %940 = dma.vmem_to_hbm [thread:$0]  %s938_s25, 128, %s1678_s5, [#allocation3]  }
 0x20b   :  { %1261 = dma.done.wait [#allocation3], 128  }
 0x20c   :  { %1262 = vsyncadd [#allocation3], 4294967168 }
 0x20d   :  { %944 = vsyncpa [#allocation3], 1 }

</bundles_post_ra>
